<compile_context>
chip_gen: v5e
topology: v5e:2x2
jax: 0.10.0
libtpu: 0.0.40
codegen_flags: <defaults>
</compile_context>

<pallas_src>
import functools

import jax
import jax.numpy as jnp
from jax.experimental import pallas as pl
from jax.experimental.pallas import tpu as pltpu

# Make the pure-JAX reference use full f32 matmul precision so it is directly
# comparable with the in-kernel f32 MXU matmuls.
jax.config.update("jax_default_matmul_precision", "highest")


def _sigmoid_fast(x):
    # Single-EUP-op sigmoid (tanh form); avoids the exp + divide of 1/(1+e^-x).
    return 0.5 * jnp.tanh(0.5 * x) + 0.5


# --------------------------- kernel 1: input projection ---------------------
def _input_proj_kernel(x_ref, w_ref, b_ref, o_ref):
    # (TILE, C) @ (C, 8H) + (1, 8H) -> lane-dense (TILE, 8H) slab of layer-0
    # gate pre-activations (input part), computed once per padded timestep.
    o_ref[...] = (
        jnp.dot(x_ref[...], w_ref[...], preferred_element_type=jnp.float32)
        + b_ref[...]
    ).astype(o_ref.dtype)


# ----------------------- kernel 2: window-group BiLSTM ----------------------
def _window_group_lstm_kernel(xg_ref, w_ref, b1_ref, feat_ref, *, window, hidden):
    """One grid step = WGROUP independent windows batched into the sublane dim.

    xg_ref  : (1, W, M, 8H)  M = WGROUP*B rows;
              cols = [fwd gates @ time s (4H) | bwd gates @ time W-1-s (4H)]
    w_ref   : (3, 2H, 8H)    [blockdiag(whh0_f, whh0_b),
                              wih1 (fwd|bwd),
                              blockdiag(whh1_f, whh1_b)]
    b1_ref  : (1, 8H)        layer-1 bias (b_ih + b_hh, fwd | bwd)
    feat_ref: (1, M, H)      mean of the 4 final hidden states per window-row
    """
    W, H = window, hidden
    M = feat_ref.shape[1]
    H4 = 4 * H

    whh0 = w_ref[0]     # (2H, 8H) block-diag layer-0 hidden weights
    wih1 = w_ref[1]     # (2H, 8H) layer-1 input weights
    whh1 = w_ref[2]     # (2H, 8H) block-diag layer-1 hidden weights
    b1 = b1_ref[...]    # (1, 8H)

    def cell(pre, c):   # pre: (M, 4H) gates [i f g o], c: (M, H)
        i_g = _sigmoid_fast(pre[:, 0 * H:1 * H])
        f_g = _sigmoid_fast(pre[:, 1 * H:2 * H])
        g_g = jnp.tanh(pre[:, 2 * H:3 * H])
        o_g = _sigmoid_fast(pre[:, 3 * H:4 * H])
        c_new = f_g * c + i_g * g_g
        return o_g * jnp.tanh(c_new), c_new

    zeros = jnp.zeros((M, H), jnp.float32)

    # ---- layer 0: fwd + bwd fused via one block-diagonal hidden GEMM/step ----
    h_f, c_f, h_b, c_b = zeros, zeros, zeros, zeros
    hf_seq, hb_seq = [], []
    for s in range(W):                                    # fully unrolled
        x_in = xg_ref[0, s]                               # (M, 8H)
        h_cat = jnp.concatenate([h_f, h_b], axis=1)       # (M, 2H)
        pre = x_in + jnp.dot(h_cat, whh0, preferred_element_type=jnp.float32)
        h_f, c_f = cell(pre[:, :H4], c_f)                 # fwd @ time s
        h_b, c_b = cell(pre[:, H4:], c_b)                 # bwd @ time W-1-s
        hf_seq.append(h_f)
        hb_seq.append(h_b)
    h0f_last, h0b_last = h_f, h_b                         # layer-0 final hiddens

    # Layer-0 outputs stay in registers; build the layer-1 input sequence in
    # natural time order and project it with one lane-dense batched GEMM.
    out0 = jnp.concatenate(
        [jnp.concatenate([hf_seq[t], hb_seq[W - 1 - t]], axis=1) for t in range(W)],
        axis=0)                                           # (W*M, 2H)
    g1 = jnp.dot(out0, wih1, preferred_element_type=jnp.float32) + b1   # (W*M, 8H)

    # ---- layer 1 ----
    h_f, c_f, h_b, c_b = zeros, zeros, zeros, zeros
    for s in range(W):
        sb = W - 1 - s
        x_in = jnp.concatenate(
            [g1[s * M:(s + 1) * M, :H4], g1[sb * M:(sb + 1) * M, H4:]], axis=1)
        h_cat = jnp.concatenate([h_f, h_b], axis=1)
        pre = x_in + jnp.dot(h_cat, whh1, preferred_element_type=jnp.float32)
        h_f, c_f = cell(pre[:, :H4], c_f)
        h_b, c_b = cell(pre[:, H4:], c_b)

    # torch.mean(h_n.permute(1,0,2), dim=1)
    feat_ref[0] = ((h0f_last + h0b_last + h_f + h_b) * 0.25).astype(feat_ref.dtype)


# --------------------------------- wrapper ----------------------------------
def _block_diag(a, b):
    """blockdiag of two (H, 4H) blocks -> (2H, 8H)."""
    za = jnp.zeros_like(a)
    return jnp.concatenate(
        [jnp.concatenate([a, za], axis=1), jnp.concatenate([za, b], axis=1)], axis=0)


def _choose_wgroup(n_win, batch, target_rows=64):
    """Windows batched per grid step: good sublane fill, but keep >=2 grid steps
    when possible (v7x has 2 TensorCores), and prefer M = wg*B sublane-aligned."""
    wg = max(1, target_rows // max(1, batch))
    if n_win >= 2:
        wg = min(wg, pl.cdiv(n_win, 2))
    wg = max(1, min(wg, n_win))
    while wg > 1 and (wg * batch) % 8 != 0:
        wg -= 1
    return wg


def sliding_window_lstm(x, lgt, params, *, window_size, stride, wgroup=None):
    """Pallas forward of SlidingWindowLSTM. x: (B, input_size, T)."""
    B, C, T = x.shape
    H = params["w_hh_l0"].shape[1]
    W = window_size
    H4, H8 = 4 * H, 8 * H
    f32 = jnp.float32

    # x.permute(0,2,1) + right-pad T so the windows tile (zeros, as in torch).
    rem = (T - W) % stride
    pad = 0 if rem == 0 else stride - rem
    T_pad = T + pad
    n_win = (T_pad - W) // stride + 1

    x_tm = jnp.transpose(x, (2, 0, 1))                    # (T, B, C) time-major
    if pad:
        x_tm = jnp.pad(x_tm, ((0, pad), (0, 0), (0, 0)))

    # ---------------- weight prep (layout plumbing, done once) --------------
    wih0 = jnp.concatenate([params["w_ih_l0"].T, params["w_ih_l0_r"].T], axis=1)
    b0 = jnp.concatenate([params["b_ih_l0"] + params["b_hh_l0"],
                          params["b_ih_l0_r"] + params["b_hh_l0_r"]])[None, :]
    whh0_bd = _block_diag(params["w_hh_l0"].T, params["w_hh_l0_r"].T)     # (2H, 8H)
    wih1 = jnp.concatenate([params["w_ih_l1"].T, params["w_ih_l1_r"].T], axis=1)
    b1 = jnp.concatenate([params["b_ih_l1"] + params["b_hh_l1"],
                          params["b_ih_l1_r"] + params["b_hh_l1_r"]])[None, :]
    whh1_bd = _block_diag(params["w_hh_l1"].T, params["w_hh_l1_r"].T)     # (2H, 8H)
    wstack = jnp.stack([whh0_bd, wih1, whh1_bd], axis=0).astype(f32)      # (3, 2H, 8H)

    # ------------- kernel 1: layer-0 input projection, row-tiled ------------
    rows = T_pad * B
    row_tile = min(512, ((rows + 7) // 8) * 8)
    rows_pad = pl.cdiv(rows, row_tile) * row_tile
    x_2d = x_tm.reshape(rows, C).astype(f32)
    if rows_pad != rows:
        x_2d = jnp.pad(x_2d, ((0, rows_pad - rows), (0, 0)))

    xproj = pl.pallas_call(
        _input_proj_kernel,
        out_shape=jax.ShapeDtypeStruct((rows_pad, H8), f32),
        grid=(rows_pad // row_tile,),
        in_specs=[pl.BlockSpec((row_tile, C), lambda i: (i, 0)),
                  pl.BlockSpec((C, H8), lambda i: (0, 0)),
                  pl.BlockSpec((1, H8), lambda i: (0, 0))],
        out_specs=pl.BlockSpec((row_tile, H8), lambda i: (i, 0)),
        compiler_params=pltpu.CompilerParams(
            dimension_semantics=("parallel",)),
    )(x_2d, wih0.astype(f32), b0.astype(f32))
    xproj = xproj[:rows].reshape(T_pad, B, H8)

    # ------ window-major regrouping: WGROUP windows per grid step -----------
    if wgroup is None:
        wgroup = _choose_wgroup(n_win, B)
    n_groups = pl.cdiv(n_win, wgroup)
    n_win_pad = n_groups * wgroup
    M = wgroup * B

    starts = jnp.arange(n_win_pad) * stride               # padded windows clipped
    t_idx = jnp.clip(starts[:, None] + jnp.arange(W)[None, :], 0, T_pad - 1)
    xw = xproj[t_idx]                                     # (n_win_pad, W, B, 8H)
    # Pre-reverse the backward direction's time so the kernel's fused fwd/bwd
    # step s reads one contiguous (M, 8H) slab.
    xw = jnp.concatenate([xw[:, :, :, :H4], xw[:, ::-1, :, H4:]], axis=-1)
    xg = xw.reshape(n_groups, wgroup, W, B, H8).transpose(0, 2, 1, 3, 4)
    xg = xg.reshape(n_groups, W, M, H8)

    # ------------- kernel 2: per-group 2-layer BiLSTM + mean(h_n) -----------
    kernel = functools.partial(_window_group_lstm_kernel, window=W, hidden=H)

    xg_block = W * M * H8 * 4
    est = (2 * xg_block                        # double-buffered input blocks
           + 2 * (wstack.size + 8 * H8) * 4    # weights + tile-padded bias
           + 4 * M * H * 4                     # double-buffered output blocks
           + 6 * xg_block)                     # in-kernel temporaries (out0, g1, spills)
    vmem_limit = int(min(64 * 2 ** 20, max(16 * 2 ** 20, est)))

    feat_g = pl.pallas_call(
        kernel,
        out_shape=jax.ShapeDtypeStruct((n_groups, M, H), f32),
        grid=(n_groups,),
        in_specs=[pl.BlockSpec((1, W, M, H8), lambda g: (g, 0, 0, 0)),
                  pl.BlockSpec((3, 2 * H, H8), lambda g: (0, 0, 0)),
                  pl.BlockSpec((1, H8), lambda g: (0, 0))],
        out_specs=pl.BlockSpec((1, M, H), lambda g: (g, 0, 0)),
        compiler_params=pltpu.CompilerParams(
            dimension_semantics=("parallel",),
            vmem_limit_bytes=vmem_limit),
    )(xg, wstack, b1.astype(f32))

    # API shapes + fc hoisted to one lane-dense XLA GEMM over all windows.
    feat = feat_g.reshape(n_win_pad, B, H)[:n_win]        # (n_win, B, H)
    logits = feat @ params["fc_w"].T + params["fc_b"]     # (n_win, B, O)

    feat_len = jnp.ceil((lgt - window_size) / stride) + 1.0   # .cpu() is a no-op here
    return {"visual_feat": feat, "conv_logits": logits, "feat_len": feat_len}


# ------------------------------ parameters ----------------------------------
def init_params(key, input_size, hidden_size, output_size):
    """PyTorch-layout params for nn.LSTM(2 layers, bidirectional) + Linear."""
    H = hidden_size
    k = 1.0 / float(jnp.sqrt(jnp.float32(H)))
    names, shapes = [], []
    for layer in (0, 1):
        in_sz = input_size if layer == 0 else 2 * hidden_size
        for suffix in ("", "_r"):
            names += [f"w_ih_l{layer}{suffix}", f"w_hh_l{layer}{suffix}",
                      f"b_ih_l{layer}{suffix}", f"b_hh_l{layer}{suffix}"]
            shapes += [(4 * H, in_sz), (4 * H, H), (4 * H,), (4 * H,)]
    names += ["fc_w", "fc_b"]
    shapes += [(output_size, H), (output_size,)]
    keys = jax.random.split(key, len(names))
    return {n: jax.random.uniform(kk, s, jnp.float32, -k, k)
            for n, s, kk in zip(names, shapes, keys)}


# ------------------------- pure-JAX reference (check) -----------------------
def _sigmoid_ref(x):
    return 1.0 / (1.0 + jnp.exp(-x))


def _lstm_layer_ref(x_seq, w_ih, w_hh, b_ih, b_hh):
    B, W, _ = x_seq.shape
    H = w_hh.shape[1]
    h = jnp.zeros((B, H), jnp.float32)
    c = jnp.zeros((B, H), jnp.float32)
    outs = []
    for t in range(W):
        g = x_seq[:, t, :] @ w_ih.T + h @ w_hh.T + b_ih + b_hh
        i_g = _sigmoid_ref(g[:, 0 * H:1 * H])
        f_g = _sigmoid_ref(g[:, 1 * H:2 * H])
        g_g = jnp.tanh(g[:, 2 * H:3 * H])
        o_g = _sigmoid_ref(g[:, 3 * H:4 * H])
        c = f_g * c + i_g * g_g
        h = o_g * jnp.tanh(c)
        outs.append(h)
    return jnp.stack(outs, axis=1), h


def sliding_window_lstm_ref(x, lgt, p, *, window_size, stride):
    B, C, T = x.shape
    xt = jnp.transpose(x, (0, 2, 1))                      # (B, T, C)
    rem = (T - window_size) % stride
    if rem != 0:
        xt = jnp.pad(xt, ((0, 0), (0, stride - rem), (0, 0)))
    feats = []
    for s in range(0, xt.shape[1] - window_size + 1, stride):
        win = xt[:, s:s + window_size, :]
        out_f, h0f = _lstm_layer_ref(win, p["w_ih_l0"], p["w_hh_l0"],
                                     p["b_ih_l0"], p["b_hh_l0"])
        out_b, h0b = _lstm_layer_ref(win[:, ::-1, :], p["w_ih_l0_r"], p["w_hh_l0_r"],
                                     p["b_ih_l0_r"], p["b_hh_l0_r"])
        x1 = jnp.concatenate([out_f, out_b[:, ::-1, :]], axis=-1)
        _, h1f = _lstm_layer_ref(x1, p["w_ih_l1"], p["w_hh_l1"],
                                 p["b_ih_l1"], p["b_hh_l1"])
        _, h1b = _lstm_layer_ref(x1[:, ::-1, :], p["w_ih_l1_r"], p["w_hh_l1_r"],
                                 p["b_ih_l1_r"], p["b_hh_l1_r"])
        feats.append((h0f + h0b + h1f + h1b) * 0.25)
    out = jnp.stack(feats, axis=1)                        # (B, n_win, H)
    logits = out @ p["fc_w"].T + p["fc_b"]
    feat_len = jnp.ceil((lgt - window_size) / stride) + 1.0
    return {"visual_feat": jnp.transpose(out, (1, 0, 2)),
            "conv_logits": jnp.transpose(logits, (1, 0, 2)),
            "feat_len": feat_len}


if __name__ == "__main__":
    key = jax.random.PRNGKey(0)
    B, C, T = 2, 16, 34          # batch, input_size, sequence length (pads to 36)
    H, O = 32, 16                # hidden_size (4H = 128 lanes), output_size
    WIN, STRIDE = 8, 4           # -> n_win = 8 windows, grouped 4 per grid step

    k_x, k_p = jax.random.split(key)
    x = jax.random.normal(k_x, (B, C, T), dtype=jnp.float32)
    lgt = jnp.array([34.0, 30.0], dtype=jnp.float32)
    params = init_params(k_p, C, H, O)

    out = sliding_window_lstm(x, lgt, params, window_size=WIN, stride=STRIDE)
    out = jax.tree_util.tree_map(jax.block_until_ready, out)

    ref = sliding_window_lstm_ref(x, lgt, params, window_size=WIN, stride=STRIDE)

    assert out["visual_feat"].shape == ref["visual_feat"].shape, \
        (out["visual_feat"].shape, ref["visual_feat"].shape)
    assert out["conv_logits"].shape == ref["conv_logits"].shape, \
        (out["conv_logits"].shape, ref["conv_logits"].shape)
    assert bool(jnp.allclose(out["visual_feat"], ref["visual_feat"],
                             rtol=2e-3, atol=2e-3)), \
        float(jnp.max(jnp.abs(out["visual_feat"] - ref["visual_feat"])))
    assert bool(jnp.allclose(out["conv_logits"], ref["conv_logits"],
                             rtol=2e-3, atol=2e-3)), \
        float(jnp.max(jnp.abs(out["conv_logits"] - ref["conv_logits"])))
    assert bool(jnp.array_equal(out["feat_len"], ref["feat_len"]))

    print("KERNEL_OK")
</pallas_src>

<mosaic_0001>
module attributes {stable_mosaic.version = 11 : i64} {
  func.func @_input_proj_kernel(%arg0: i32, %arg1: memref<72x16xf32, #tpu.memory_space<vmem>>, %arg2: memref<16x256xf32, #tpu.memory_space<vmem>>, %arg3: memref<1x256xf32, #tpu.memory_space<vmem>>, %arg4: memref<72x256xf32, #tpu.memory_space<vmem>>) attributes {dimension_semantics = [#tpu.dimension_semantics<parallel>], iteration_bounds = array<i64: 1>, scalar_prefetch = 0 : i64, scratch_operands = 0 : i64, tpu.core_type = #tpu.core_type<tc>, window_params = [{transform_indices = @transform_0, window_bounds = array<i64: 72, 16>}, {pipeline_mode = #tpu.pipeline_mode<synchronous>, transform_indices = @transform_1, window_bounds = array<i64: 16, 256>}, {pipeline_mode = #tpu.pipeline_mode<synchronous>, transform_indices = @transform_2, window_bounds = array<i64: 1, 256>}, {transform_indices = @transform_3, window_bounds = array<i64: 72, 256>}]} {
    %c0 = arith.constant 0 : index
    %c0_0 = arith.constant 0 : index
    %0 = vector.load %arg1[%c0, %c0_0] : memref<72x16xf32, #tpu.memory_space<vmem>>, vector<72x16xf32>
    %c0_1 = arith.constant 0 : index
    %c0_2 = arith.constant 0 : index
    %1 = vector.load %arg2[%c0_1, %c0_2] : memref<16x256xf32, #tpu.memory_space<vmem>>, vector<16x256xf32>
    %cst = arith.constant dense<0.000000e+00> : vector<72x256xf32>
    %2 = tpu.matmul %0, %1, %cst {dimension_numbers = #tpu.dot_dimension_numbers<[1], [0], [0], [1], [0, 0, 1, 1], [], []>, precision = #tpu.contract_precision<fp32>} : vector<72x16xf32>, vector<16x256xf32>, vector<72x256xf32> -> vector<72x256xf32>
    %c0_3 = arith.constant 0 : index
    %c0_4 = arith.constant 0 : index
    %3 = vector.load %arg3[%c0_3, %c0_4] : memref<1x256xf32, #tpu.memory_space<vmem>>, vector<1x256xf32>
    %4 = vector.broadcast %3 : vector<1x256xf32> to vector<72x256xf32>
    %5 = arith.addf %2, %4 : vector<72x256xf32>
    %c0_5 = arith.constant 0 : index
    %c0_6 = arith.constant 0 : index
    %6 = vector.load %arg4[%c0_5, %c0_6] : memref<72x256xf32, #tpu.memory_space<vmem>>, vector<72x256xf32>
    tpu.vector_store %arg4[%c0_5, %c0_6], %5 {strides = array<i32>} : memref<72x256xf32, #tpu.memory_space<vmem>>, vector<72x256xf32>,
    return
  }
  func.func @transform_0(%arg0: i32) -> (i32, i32) {
    %c0_i32 = arith.constant 0 : i32
    %c0_i32_0 = arith.constant 0 : i32
    return %arg0, %c0_i32 : i32, i32
  }
  func.func @transform_1(%arg0: i32) -> (i32, i32) {
    %c0_i32 = arith.constant 0 : i32
    %c0_i32_0 = arith.constant 0 : i32
    %c0_i32_1 = arith.constant 0 : i32
    return %c0_i32, %c0_i32_0 : i32, i32
  }
  func.func @transform_2(%arg0: i32) -> (i32, i32) {
    %c0_i32 = arith.constant 0 : i32
    %c0_i32_0 = arith.constant 0 : i32
    %c0_i32_1 = arith.constant 0 : i32
    return %c0_i32, %c0_i32_0 : i32, i32
  }
  func.func @transform_3(%arg0: i32) -> (i32, i32) {
    %c0_i32 = arith.constant 0 : i32
    %c0_i32_0 = arith.constant 0 : i32
    return %arg0, %c0_i32 : i32, i32
  }
}

</mosaic_0001>

<bundles_post_ra>
// kernel: tpu_custom_call.1
= control target key start
LH: loop header
LB: loop body
LE: loop exit
PB: predicated region body
PF: predicated region fallthrough
CT: control target
= control target key end

     0   :  { %vm34_vm0 = vcmask 130048   ;;  %s1300_s0 = inlined_call_operand.vmem [shape: f32[72,16], index: 0, kind: input, shape index: {}]   ;;  %s1301_s1 = inlined_call_operand.vmem [shape: f32[16,256], index: 1, kind: input, shape index: {}]   ;;  %s1302_s2 = inlined_call_operand.vmem [shape: f32[1,256], index: 2, kind: input, shape index: {}]   ;;  %s1303_s3 = inlined_call_operand.hbm [shape: f32[72,256], index: 3, kind: output, shape index: {}]  }
   0x1   :  { %v26_v0 = vld [vmem:[%s1301_s1 + $0x10] sm:$0xff]  ;;  %v24_v1 = vld [vmem:[%s1301_s1] sm:$0xff]  ;;  %v27_v6 = vld [vmem:[%s1301_s1 + $0x18] sm:$0xff] }
   0x2   :  { %v15_v2 = vld [vmem:[%s1300_s0] sm:$0xff]  ;;  %v76_v3 = vand.u32 4294901760, %v26_v0  ;;  %v78_v4 = vand.u32 4294901760, %v24_v1  ;;  %v16_v7 = vld [vmem:[%s1300_s0 + $0x8] sm:$0xff]  ;;  %v982_v9 = vand.u32 4294901760, %v27_v6  ;;  %v17_v11 = vld [vmem:[%s1300_s0 + $0x10] sm:$0xff] }
   0x3   :  { %v36_v5 = vsel %vm34_vm0, %v15_v2, 0  ;;  %v39_v10 = vsel %vm34_vm0, %v16_v7, 0 }
   0x4   :  { %v980_v8 = vand.u32 4294901760, %v36_v5  ;;  %v168_v12 = vsub.f32 %v26_v0, %v76_v3  ;;  %77 = vmatpush.msra.mxu0 %v76_v3  ;;  %v174_v13 = vsub.f32 %v24_v1, %v78_v4  ;;  %297 = vmatpush.msra.mxu3 %v76_v3  ;;  %v988_v14 = vand.u32 4294901760, %v39_v10 }
   0x5   :  { %8 = vsyncpa [#allocation3], 0  ;;  %v575_v16 = vsub.f32 %v27_v6, %v982_v9  ;;  %v42_v20 = vsel %vm34_vm0, %v17_v11, 0  ;;  %v18_v33 = vld [vmem:[%s1300_s0 + $0x18] sm:$0xff]  ;;  %v25_v37 = vld [vmem:[%s1301_s1 + $0x8] sm:$0xff]  ;;  %s900_s14 = sshll.u32 %s1303_s3, 4  ;;  %s901_s14 = int_to_ptr.hbm [resolvable:$true] %s900_s14 }
   0x6   :  { %v991_v15 = vsub.f32 %v36_v5, %v980_v8  ;;  %232 = vmatpush.msra.mxu2 %v168_v12  ;;  %79 = vmatpush.msra.mxu0 %v78_v4  ;;  %v169_v17 = vand.u32 4294901760, %v168_v12  ;;  %v175_v18 = vand.u32 4294901760, %v174_v13  ;;  %v995_v19 = vsub.f32 %v39_v10, %v988_v14  ;;  %v19_v43 = vld [vmem:[%s1300_s0 + $0x20] sm:$0xff]  ;;  %v20_v53 = vld [vmem:[%s1300_s0 + $0x28] sm:$0xff]  ;;  %v21_v60 = vld [vmem:[%s1300_s0 + $0x30] sm:$0xff]  ;;  %s942_s15 = smov 256  }
   0x7   :  { %299 = vmatpush.msra.mxu3 %v78_v4  ;;  %v576_v22 = vand.u32 4294901760, %v575_v16  ;;  %v1008_v28 = vand.u32 4294901760, %v42_v20  ;;  %v45_v36 = vsel %vm34_vm0, %v18_v33, 0  ;;  %v485_v38 = vand.u32 4294901760, %v25_v37  ;;  %v23_v11 = vld [vmem:[%s1300_s0 + $0x40] sm:$0xff]  ;;  %s943_s16 = smov 16  }
   0x8   :  { %v999_v21 = vand.u32 4294901760, %v991_v15  ;;  %235 = vmatpush.msra.mxu2 %v174_v13  ;;  %v170_v23 = vsub.f32 %v168_v12, %v169_v17  ;;  %372 = vmatpush.msrb.mxu0 %v169_v17  ;;  %v176_v24 = vsub.f32 %v174_v13, %v175_v18  ;;  %v1006_v27 = vand.u32 4294901760, %v995_v19 }
   0x9   :  { %238 = vmatmul.f32.vlgmr.msra.gmra.mxu2 %v991_v15  ;;  %v577_v26 = vsub.f32 %v575_v16, %v576_v22  ;;  %v1020_v35 = vsub.f32 %v42_v20, %v1008_v28  ;;  %v1034_v41 = vand.u32 4294901760, %v45_v36  ;;  %v581_v42 = vsub.f32 %v25_v37, %v485_v38 }
   0xa   :  { %v83_v25 = vsub.f32 %v991_v15, %v999_v21  ;;  %303 = vmatmul.f32.vlgmr.msra.gmra.mxu3 %v999_v21  ;;  %484 = vmatpush.msrb.mxu2 %v982_v9  ;;  %v171_v29 = vand.u32 4294901760, %v170_v23  ;;  %v177_v30 = vand.u32 4294901760, %v176_v24  ;;  %v91_v34 = vsub.f32 %v995_v19, %v1006_v27 }
   0xb   :  { %376 = vmatpush.msrb.mxu0 %v175_v18  ;;  %v578_v32 = vand.u32 4294901760, %v577_v26  ;;  %v1032_v40 = vand.u32 4294901760, %v1020_v35  ;;  %v582_v44 = vand.u32 4294901760, %v581_v42  ;;  %v1044_v46 = vsub.f32 %v45_v36, %v1034_v41 }
   0xc   :  { %v1011_v31 = vand.u32 4294901760, %v83_v25  ;;  %172 = vmatpush.msra.mxu1 %v171_v29  ;;  %v1028_v39 = vand.u32 4294901760, %v91_v34  ;;  %486 = vmatpush.msrb.mxu2 %v485_v38  ;;  %v48_v47 = vsel %vm34_vm0, %v19_v43, 0  ;;  %v51_v56 = vsel %vm34_vm0, %v20_v53, 0 }
   0xd   :  { %579 = vmatpush.msrb.mxu3 %v578_v32  ;;  %v99_v45 = vsub.f32 %v1020_v35, %v1032_v40  ;;  %v583_v48 = vsub.f32 %v581_v42, %v582_v44  ;;  %v1053_v51 = vand.u32 4294901760, %v1044_v46  ;;  %v1055_v52 = vand.u32 4294901760, %v48_v47 }
   0xe   :  { %85 = vmatmul.f32.vlgmr.msra.gmra.mxu0 %v1011_v31  ;;  %178 = vmatpush.msra.mxu1 %v177_v30  ;;  %v1076_v59 = vand.u32 4294901760, %v51_v56  ;;  %v54_v63 = vsel %vm34_vm0, %v21_v60, 0  ;;  %v1173_v30 = vld [vmem:[%s1302_s2] sm:$0x3]  ;;  %s941_s2 = smov [#allocation2]  }
   0xf   :  { %639 = vmatpush.msra.mxu0 %v575_v16  ;;  %180 = vmatmul.f32.vlgmr.msra.gmra.mxu1 %v980_v8  ;;  %v584_v49 = vand.u32 4294901760, %v583_v48  ;;  %v1049_v50 = vand.u32 4294901760, %v99_v45  ;;  %v107_v54 = vsub.f32 %v1044_v46, %v1053_v51  ;;  %v1065_v55 = vsub.f32 %v48_v47, %v1055_v52  ;;  %s898_s11 = sshll.u32 %s941_s2, 4  ;;  %s899_s11 = int_to_ptr.vmem [resolvable:$true] %s898_s11 }
  0x10   :  { %429 = vmatpush.msrb.mxu1 %v76_v3  ;;  %779 = vmatpush.msra.mxu2 %v576_v22  ;;  %v1085_v62 = vsub.f32 %v51_v56, %v1076_v59  ;;  %v1094_v2 = vand.u32 4294901760, %v54_v63  ;;  %v22_v3 = vld [vmem:[%s1300_s0 + $0x38] sm:$0xff]  ;;  %v60_v16 = vsel %vm34_vm0, %v23_v11, 0 }
  0x11   :  { %243 = vmatmul.f32.gmra.mxu2 %v995_v19  ;;  %642 = vmatpush.msra.mxu0 %v581_v42  ;;  %v1070_v57 = vand.u32 4294901760, %v107_v54  ;;  %v1074_v58 = vand.u32 4294901760, %v1065_v55  ;;  %v57_v6 = vsel %vm34_vm0, %v22_v3, 0  ;;  %v1128_v20 = vand.u32 4294901760, %v60_v16 }
  0x12   :  { %309 = vmatmul.f32.gmra.mxu3 %v1006_v27  ;;  %431 = vmatpush.msrb.mxu1 %v78_v4  ;;  %v1092_v1 = vand.u32 4294901760, %v1085_v62  ;;  %v1102_v5 = vsub.f32 %v54_v63, %v1094_v2  ;;  %v1111_v10 = vand.u32 4294901760, %v57_v6 }
  0x13   :  { %783 = vmatpush.msra.mxu2 %v582_v44  ;;  %585 = vmatpush.msrb.mxu3 %v584_v49  ;;  %v115_v61 = vsub.f32 %v1065_v55, %v1074_v58  ;;  %v1133_v23 = vsub.f32 %v60_v16, %v1128_v20 }
  0x14   :  { %704 = vmatpush.msra.mxu1 %v982_v9  ;;  %v123_v4 = vsub.f32 %v1085_v62, %v1092_v1  ;;  %v1119_v13 = vsub.f32 %v57_v6, %v1111_v10 }
  0x15   :  { %836 = vmatpush.msra.mxu3 %v982_v9  ;;  %v116_v0 = vand.u32 4294901760, %v115_v61  ;;  %v1109_v9 = vand.u32 4294901760, %v1102_v5  ;;  %v1139_v25 = vand.u32 4294901760, %v1133_v23 }
  0x16   :  { %93 = vmatmul.f32.gmra.mxu0 %v1028_v39  ;;  %706 = vmatpush.msra.mxu1 %v485_v38  ;;  %v124_v7 = vand.u32 4294901760, %v123_v4  ;;  %v1126_v18 = vand.u32 4294901760, %v1119_v13 }
  0x17   :  { %184 = vmatmul.f32.gmra.mxu1 %v988_v14  ;;  %838 = vmatpush.msra.mxu3 %v485_v38  ;;  %v131_v12 = vsub.f32 %v1102_v5, %v1109_v9  ;;  %v147_v26 = vsub.f32 %v1133_v23, %v1139_v25 }
  0x18   :  { %v139_v22 = vsub.f32 %v1119_v13, %v1126_v18 }
  0x19   :  { %248 = vmatmul.f32.gmra.mxu2 %v1020_v35  ;;  %v132_v17 = vand.u32 4294901760, %v131_v12  ;;  %v148_v29 = vand.u32 4294901760, %v147_v26 }
  0x1a   :  { %315 = vmatmul.f32.gmra.mxu3 %v1032_v40  ;;  %v140_v24 = vand.u32 4294901760, %v139_v22 }
  0x1e   :  { %101 = vmatmul.f32.gmra.mxu0 %v1049_v50 }
  0x1f   :  { %188 = vmatmul.f32.gmra.mxu1 %v1008_v28 }
  0x21   :  { %253 = vmatmul.f32.gmra.mxu2 %v1044_v46 }
  0x22   :  { %321 = vmatmul.f32.gmra.mxu3 %v1053_v51 }
  0x26   :  { %109 = vmatmul.f32.gmra.mxu0 %v1070_v57 }
  0x27   :  { %192 = vmatmul.f32.gmra.mxu1 %v1034_v41 }
  0x29   :  { %258 = vmatmul.f32.gmra.mxu2 %v1065_v55 }
  0x2a   :  { %327 = vmatmul.f32.gmra.mxu3 %v1074_v58 }
  0x2e   :  { %117 = vmatmul.f32.gmra.mxu0 %v116_v0 }
  0x2f   :  { %196 = vmatmul.f32.gmra.mxu1 %v1055_v52 }
  0x31   :  { %263 = vmatmul.f32.gmra.mxu2 %v1085_v62 }
  0x32   :  { %333 = vmatmul.f32.gmra.mxu3 %v1092_v1 }
  0x36   :  { %125 = vmatmul.f32.gmra.mxu0 %v124_v7 }
  0x37   :  { %200 = vmatmul.f32.gmra.mxu1 %v1076_v59 }
  0x39   :  { %268 = vmatmul.f32.gmra.mxu2 %v1102_v5 }
  0x3a   :  { %339 = vmatmul.f32.gmra.mxu3 %v1109_v9 }
  0x3e   :  { %133 = vmatmul.f32.gmra.mxu0 %v132_v17 }
  0x3f   :  { %204 = vmatmul.f32.gmra.mxu1 %v1094_v2 }
  0x41   :  { %273 = vmatmul.f32.gmra.mxu2 %v1119_v13 }
  0x42   :  { %345 = vmatmul.f32.gmra.mxu3 %v1126_v18 }
  0x46   :  { %141 = vmatmul.f32.gmra.mxu0 %v140_v24 }
  0x47   :  { %208 = vmatmul.f32.gmra.mxu1 %v1111_v10 }
  0x49   :  { %278 = vmatmul.f32.gmra.mxu2 %v1133_v23 }
  0x4a   :  { %351 = vmatmul.f32.gmra.mxu3 %v1139_v25 }
  0x4e   :  { %149 = vmatmul.f32.gmra.mxu0 %v148_v29 }
  0x4f   :  { %212 = vmatmul.f32.gmra.mxu1 %v1128_v20 }
  0x51   :  { %492 = vmatmul.f32.vlgmr.msrb.gmra.mxu2 %v1011_v31  ;;  %v1178_v31 = vperm.slane %v1173_v30, 0 }
  0x52   :  { %587 = vmatmul.f32.vlgmr.msrb.gmra.mxu3 %v980_v8 }
  0x56   :  { %378 = vmatmul.f32.vlgmr.msrb.gmra.mxu0 %v980_v8 }
  0x57   :  { %433 = vmatmul.f32.vlgmr.msrb.gmra.mxu1 %v980_v8 }
  0x59   :  { %500 = vmatmul.f32.gmra.mxu2 %v1028_v39 }
  0x5a   :  { %591 = vmatmul.f32.gmra.mxu3 %v988_v14 }
  0x5e   :  { %382 = vmatmul.f32.gmra.mxu0 %v988_v14 }
  0x5f   :  { %437 = vmatmul.f32.gmra.mxu1 %v988_v14 }
  0x61   :  { %508 = vmatmul.f32.gmra.mxu2 %v1049_v50 }
  0x62   :  { %595 = vmatmul.f32.gmra.mxu3 %v1008_v28 }
  0x66   :  { %386 = vmatmul.f32.gmra.mxu0 %v1008_v28 }
  0x67   :  { %441 = vmatmul.f32.gmra.mxu1 %v1008_v28 }
  0x69   :  { %516 = vmatmul.f32.gmra.mxu2 %v1070_v57 }
  0x6a   :  { %599 = vmatmul.f32.gmra.mxu3 %v1034_v41 }
  0x6e   :  { %390 = vmatmul.f32.gmra.mxu0 %v1034_v41 }
  0x6f   :  { %445 = vmatmul.f32.gmra.mxu1 %v1034_v41 }
  0x71   :  { %524 = vmatmul.f32.gmra.mxu2 %v116_v0 }
  0x72   :  { %603 = vmatmul.f32.gmra.mxu3 %v1055_v52 }
  0x76   :  { %394 = vmatmul.f32.gmra.mxu0 %v1055_v52 }
  0x77   :  { %449 = vmatmul.f32.gmra.mxu1 %v1055_v52 }
  0x79   :  { %532 = vmatmul.f32.gmra.mxu2 %v124_v7 }
  0x7a   :  { %607 = vmatmul.f32.gmra.mxu3 %v1076_v59 }
  0x7e   :  { %398 = vmatmul.f32.gmra.mxu0 %v1076_v59 }
  0x7f   :  { %453 = vmatmul.f32.gmra.mxu1 %v1076_v59 }
  0x81   :  { %540 = vmatmul.f32.gmra.mxu2 %v132_v17 }
  0x82   :  { %611 = vmatmul.f32.gmra.mxu3 %v1094_v2 }
  0x86   :  { %402 = vmatmul.f32.gmra.mxu0 %v1094_v2 }
  0x87   :  { %457 = vmatmul.f32.gmra.mxu1 %v1094_v2 }
  0x89   :  { %548 = vmatmul.f32.gmra.mxu2 %v140_v24 }
  0x8a   :  { %615 = vmatmul.f32.gmra.mxu3 %v1111_v10 }
  0x8b   :  { %v86_v32 = vpop.f32.mrf.mxu0 }
  0x8c   :  { %v87_v33 = vadd.f32 %v86_v32, %v1178_v31  ;;  %v181_v34 = vpop.f32.mrf.mxu1  ;;  %v239_v36 = vpop.f32.mrf.mxu2 }
  0x8d   :  { %v304_v38 = vpop.f32.mrf.mxu3 }
  0x8e   :  { %v182_v37 = vadd.f32 %v181_v34, %v87_v33  ;;  %406 = vmatmul.f32.gmra.mxu0 %v1111_v10 }
  0x8f   :  { %461 = vmatmul.f32.gmra.mxu1 %v1111_v10 }
  0x90   :  { %v240_v39 = vadd.f32 %v239_v36, %v182_v37 }
  0x91   :  { %556 = vmatmul.f32.gmra.mxu2 %v148_v29 }
  0x92   :  { %v1184_v42 = vadd.f32 %v304_v38, %v240_v39  ;;  %619 = vmatmul.f32.gmra.mxu3 %v1128_v20 }
  0x93   :  { %v94_v43 = vpop.f32.mrf.mxu0 }
  0x94   :  { %v95_v44 = vadd.f32 %v94_v43, %v1178_v31  ;;  %v185_v45 = vpop.f32.mrf.mxu1  ;;  %v244_v47 = vpop.f32.mrf.mxu2 }
  0x95   :  { %v310_v49 = vpop.f32.mrf.mxu3 }
  0x96   :  { %v186_v48 = vadd.f32 %v185_v45, %v95_v44  ;;  %410 = vmatmul.f32.gmra.mxu0 %v1128_v20 }
  0x97   :  { %465 = vmatmul.f32.gmra.mxu1 %v1128_v20 }
  0x98   :  { %v245_v50 = vadd.f32 %v244_v47, %v186_v48 }
  0x99   :  { %785 = vmatmul.f32.vlgmr.msra.gmra.mxu2 %v980_v8 }
  0x9a   :  { %v1190_v53 = vadd.f32 %v310_v49, %v245_v50  ;;  %840 = vmatmul.f32.vlgmr.msra.gmra.mxu3 %v980_v8 }
  0x9b   :  { %v102_v54 = vpop.f32.mrf.mxu0 }
  0x9c   :  { %v103_v56 = vadd.f32 %v102_v54, %v1178_v31  ;;  %v189_v57 = vpop.f32.mrf.mxu1  ;;  %v249_v60 = vpop.f32.mrf.mxu2 }
  0x9d   :  { %v316_v63 = vpop.f32.mrf.mxu3 }
  0x9e   :  { %v190_v61 = vadd.f32 %v189_v57, %v103_v56  ;;  %645 = vmatmul.f32.vlgmr.msra.gmra.mxu0 %v991_v15 }
  0x9f   :  { %710 = vmatmul.f32.vlgmr.msra.gmra.mxu1 %v999_v21 }
  0xa0   :  { %v250_v0 = vadd.f32 %v249_v60, %v190_v61 }
  0xa1   :  { %789 = vmatmul.f32.gmra.mxu2 %v988_v14 }
  0xa2   :  { %v1197_v3 = vadd.f32 %v316_v63, %v250_v0  ;;  %844 = vmatmul.f32.gmra.mxu3 %v988_v14 }
  0xa3   :  { %v110_v4 = vpop.f32.mrf.mxu0 }
  0xa4   :  { %v111_v8 = vadd.f32 %v110_v4, %v1178_v31  ;;  %v193_v6 = vpop.f32.mrf.mxu1  ;;  %v254_v7 = vpop.f32.mrf.mxu2 }
  0xa5   :  { %v322_v12 = vpop.f32.mrf.mxu3 }
  0xa6   :  { %v194_v11 = vadd.f32 %v193_v6, %v111_v8  ;;  %650 = vmatmul.f32.gmra.mxu0 %v995_v19 }
  0xa7   :  { %716 = vmatmul.f32.gmra.mxu1 %v1006_v27 }
  0xa8   :  { %v255_v15 = vadd.f32 %v254_v7, %v194_v11 }
  0xa9   :  { %793 = vmatmul.f32.gmra.mxu2 %v1008_v28 }
  0xaa   :  { %v1204_v16 = vadd.f32 %v322_v12, %v255_v15  ;;  %848 = vmatmul.f32.gmra.mxu3 %v1008_v28 }
  0xab   :  { %v118_v21 = vpop.f32.mrf.mxu0 }
  0xac   :  { %v119_v14 = vadd.f32 %v118_v21, %v1178_v31  ;;  %v197_v17 = vpop.f32.mrf.mxu1  ;;  %v259_v22 = vpop.f32.mrf.mxu2 }
  0xad   :  { %v328_v26 = vpop.f32.mrf.mxu3 }
  0xae   :  { %v198_v24 = vadd.f32 %v197_v17, %v119_v14  ;;  %655 = vmatmul.f32.gmra.mxu0 %v1020_v35 }
  0xaf   :  { %722 = vmatmul.f32.gmra.mxu1 %v1032_v40 }
  0xb0   :  { %v260_v19 = vadd.f32 %v259_v22, %v198_v24 }
  0xb1   :  { %797 = vmatmul.f32.gmra.mxu2 %v1034_v41 }
  0xb2   :  { %v1211_v29 = vadd.f32 %v328_v26, %v260_v19  ;;  %852 = vmatmul.f32.gmra.mxu3 %v1034_v41 }
  0xb3   :  { %v126_v27 = vpop.f32.mrf.mxu0 }
  0xb4   :  { %v127_v28 = vadd.f32 %v126_v27, %v1178_v31  ;;  %v201_v32 = vpop.f32.mrf.mxu1  ;;  %v264_v33 = vpop.f32.mrf.mxu2 }
  0xb5   :  { %v334_v36 = vpop.f32.mrf.mxu3 }
  0xb6   :  { %v202_v34 = vadd.f32 %v201_v32, %v127_v28  ;;  %660 = vmatmul.f32.gmra.mxu0 %v1044_v46 }
  0xb7   :  { %728 = vmatmul.f32.gmra.mxu1 %v1053_v51 }
  0xb8   :  { %v265_v35 = vadd.f32 %v264_v33, %v202_v34 }
  0xb9   :  { %801 = vmatmul.f32.gmra.mxu2 %v1055_v52 }
  0xba   :  { %v1218_v37 = vadd.f32 %v334_v36, %v265_v35  ;;  %856 = vmatmul.f32.gmra.mxu3 %v1055_v52 }
  0xbb   :  { %v134_v40 = vpop.f32.mrf.mxu0 }
  0xbc   :  { %v135_v41 = vadd.f32 %v134_v40, %v1178_v31  ;;  %v205_v38 = vpop.f32.mrf.mxu1  ;;  %v269_v39 = vpop.f32.mrf.mxu2 }
  0xbd   :  { %v340_v44 = vpop.f32.mrf.mxu3 }
  0xbe   :  { %v206_v43 = vadd.f32 %v205_v38, %v135_v41  ;;  %665 = vmatmul.f32.gmra.mxu0 %v1065_v55 }
  0xbf   :  { %734 = vmatmul.f32.gmra.mxu1 %v1074_v58 }
  0xc0   :  { %v270_v46 = vadd.f32 %v269_v39, %v206_v43 }
  0xc1   :  { %805 = vmatmul.f32.gmra.mxu2 %v1076_v59 }
  0xc2   :  { %v1225_v45 = vadd.f32 %v340_v44, %v270_v46  ;;  %860 = vmatmul.f32.gmra.mxu3 %v1076_v59 }
  0xc3   :  { %v142_v51 = vpop.f32.mrf.mxu0 }
  0xc4   :  { %v143_v52 = vadd.f32 %v142_v51, %v1178_v31  ;;  %v209_v47 = vpop.f32.mrf.mxu1  ;;  %v274_v48 = vpop.f32.mrf.mxu2 }
  0xc5   :  { %v346_v50 = vpop.f32.mrf.mxu3 }
  0xc6   :  { %v210_v49 = vadd.f32 %v209_v47, %v143_v52  ;;  %670 = vmatmul.f32.gmra.mxu0 %v1085_v62 }
  0xc7   :  { %740 = vmatmul.f32.gmra.mxu1 %v1092_v1  ;;  %v1244_v1 = vperm.slane %v1173_v30, 1 }
  0xc8   :  { %v275_v55 = vadd.f32 %v274_v48, %v210_v49 }
  0xc9   :  { %809 = vmatmul.f32.gmra.mxu2 %v1094_v2 }
  0xca   :  { %v1232_v54 = vadd.f32 %v346_v50, %v275_v55  ;;  %864 = vmatmul.f32.gmra.mxu3 %v1094_v2 }
  0xcb   :  { %v150_v58 = vpop.f32.mrf.mxu0 }
  0xcc   :  { %v151_v59 = vadd.f32 %v150_v58, %v1178_v31  ;;  %v213_v56 = vpop.f32.mrf.mxu1  ;;  %v279_v57 = vpop.f32.mrf.mxu2 }
  0xcd   :  { %v352_v61 = vpop.f32.mrf.mxu3 }
  0xce   :  { %v214_v60 = vadd.f32 %v213_v56, %v151_v59  ;;  %675 = vmatmul.f32.gmra.mxu0 %v1102_v5 }
  0xcf   :  { %746 = vmatmul.f32.gmra.mxu1 %v1109_v9 }
  0xd0   :  { %v280_v62 = vadd.f32 %v279_v57, %v214_v60 }
  0xd1   :  { %813 = vmatmul.f32.gmra.mxu2 %v1111_v10 }
  0xd2   :  { %v1239_v63 = vadd.f32 %v352_v61, %v280_v62  ;;  %868 = vmatmul.f32.gmra.mxu3 %v1111_v10 }
  0xd3   :  { %v379_v2 = vpop.f32.mrf.mxu0 }
  0xd4   :  { %v380_v31 = vadd.f32 %v379_v2, %v1184_v42  ;;  %v434_v0 = vpop.f32.mrf.mxu1  ;;  %v493_v4 = vpop.f32.mrf.mxu2 }
  0xd5   :  { %v494_v5 = vadd.f32 %v493_v4, %v1244_v1  ;;  %v588_v9 = vpop.f32.mrf.mxu3 }
  0xd6   :  { %v435_v8 = vadd.f32 %v434_v0, %v380_v31  ;;  %680 = vmatmul.f32.gmra.mxu0 %v1119_v13 }
  0xd7   :  { %752 = vmatmul.f32.gmra.mxu1 %v1126_v18  ;;  %v1250_v6 = vadd.f32 %v588_v9, %v494_v5 }
  0xd8   :  { %876 = vst [vmem:[#allocation2] sm:$0xff] %v435_v8 }
  0xd9   :  { %817 = vmatmul.f32.gmra.mxu2 %v1128_v20 }
  0xda   :  { %872 = vmatmul.f32.gmra.mxu3 %v1128_v20 }
  0xdb   :  { %v383_v10 = vpop.f32.mrf.mxu0 }
  0xdc   :  { %v384_v30 = vadd.f32 %v383_v10, %v1190_v53  ;;  %v438_v42 = vpop.f32.mrf.mxu1  ;;  %v501_v7 = vpop.f32.mrf.mxu2 }
  0xdd   :  { %v502_v13 = vadd.f32 %v501_v7, %v1244_v1  ;;  %v592_v12 = vpop.f32.mrf.mxu3 }
  0xde   :  { %v439_v11 = vadd.f32 %v438_v42, %v384_v30  ;;  %685 = vmatmul.f32.gmra.mxu0 %v1133_v23 }
  0xdf   :  { %758 = vmatmul.f32.gmra.mxu1 %v1139_v25  ;;  %v1258_v18 = vadd.f32 %v592_v12, %v502_v13 }
  0xe0   :  { %878 = vst [vmem:[#allocation2 + $0x10] sm:$0xff] %v439_v11 }
  0xe3   :  { %v387_v15 = vpop.f32.mrf.mxu0 }
  0xe4   :  { %v388_v21 = vadd.f32 %v387_v15, %v1197_v3  ;;  %v442_v20 = vpop.f32.mrf.mxu1  ;;  %v509_v14 = vpop.f32.mrf.mxu2 }
  0xe5   :  { %v510_v53 = vadd.f32 %v509_v14, %v1244_v1  ;;  %v596_v22 = vpop.f32.mrf.mxu3 }
  0xe6   :  { %v443_v17 = vadd.f32 %v442_v20, %v388_v21 }
  0xe7   :  { %v1262_v24 = vadd.f32 %v596_v22, %v510_v53 }
  0xe8   :  { %880 = vst [vmem:[#allocation2 + $0x20] sm:$0xff] %v443_v17 }
  0xeb   :  { %v391_v23 = vpop.f32.mrf.mxu0 }
  0xec   :  { %v392_v26 = vadd.f32 %v391_v23, %v1204_v16  ;;  %v446_v19 = vpop.f32.mrf.mxu1  ;;  %v517_v27 = vpop.f32.mrf.mxu2 }
  0xed   :  { %v518_v28 = vadd.f32 %v517_v27, %v1244_v1  ;;  %v600_v32 = vpop.f32.mrf.mxu3 }
  0xee   :  { %v447_v25 = vadd.f32 %v446_v19, %v392_v26 }
  0xef   :  { %v1266_v3 = vadd.f32 %v600_v32, %v518_v28 }
  0xf0   :  { %882 = vst [vmem:[#allocation2 + $0x30] sm:$0xff] %v447_v25 }
  0xf3   :  { %v395_v33 = vpop.f32.mrf.mxu0 }
  0xf4   :  { %v396_v34 = vadd.f32 %v395_v33, %v1211_v29  ;;  %v450_v36 = vpop.f32.mrf.mxu1  ;;  %v525_v35 = vpop.f32.mrf.mxu2 }
  0xf5   :  { %v526_v41 = vadd.f32 %v525_v35, %v1244_v1  ;;  %v604_v38 = vpop.f32.mrf.mxu3 }
  0xf6   :  { %v451_v40 = vadd.f32 %v450_v36, %v396_v34 }
  0xf7   :  { %v1270_v16 = vadd.f32 %v604_v38, %v526_v41 }
  0xf8   :  { %884 = vst [vmem:[#allocation2 + $0x40] sm:$0xff] %v451_v40 }
  0xfb   :  { %v399_v39 = vpop.f32.mrf.mxu0 }
  0xfc   :  { %v400_v43 = vadd.f32 %v399_v39, %v1218_v37  ;;  %v454_v44 = vpop.f32.mrf.mxu1  ;;  %v533_v46 = vpop.f32.mrf.mxu2 }
  0xfd   :  { %v534_v52 = vadd.f32 %v533_v46, %v1244_v1  ;;  %v608_v47 = vpop.f32.mrf.mxu3 }
  0xfe   :  { %v455_v51 = vadd.f32 %v454_v44, %v400_v43 }
  0xff   :  { %v1274_v29 = vadd.f32 %v608_v47, %v534_v52 }
 0x100   :  { %886 = vst [vmem:[#allocation2 + $0x50] sm:$0xff] %v455_v51 }
 0x103   :  { %v403_v48 = vpop.f32.mrf.mxu0 }
 0x104   :  { %v404_v49 = vadd.f32 %v403_v48, %v1225_v45  ;;  %v458_v50 = vpop.f32.mrf.mxu1  ;;  %v541_v55 = vpop.f32.mrf.mxu2 }
 0x105   :  { %v542_v59 = vadd.f32 %v541_v55, %v1244_v1  ;;  %v612_v56 = vpop.f32.mrf.mxu3 }
 0x106   :  { %v459_v58 = vadd.f32 %v458_v50, %v404_v49 }
 0x107   :  { %v1278_v37 = vadd.f32 %v612_v56, %v542_v59 }
 0x108   :  { %888 = vst [vmem:[#allocation2 + $0x60] sm:$0xff] %v459_v58 }
 0x10b   :  { %v407_v57 = vpop.f32.mrf.mxu0 }
 0x10c   :  { %v408_v60 = vadd.f32 %v407_v57, %v1232_v54  ;;  %v462_v61 = vpop.f32.mrf.mxu1  ;;  %v549_v62 = vpop.f32.mrf.mxu2 }
 0x10d   :  { %v550_v31 = vadd.f32 %v549_v62, %v1244_v1  ;;  %v616_v0 = vpop.f32.mrf.mxu3 }
 0x10e   :  { %v463_v2 = vadd.f32 %v462_v61, %v408_v60 }
 0x10f   :  { %v1282_v45 = vadd.f32 %v616_v0, %v550_v31 }
 0x110   :  { %890 = vst [vmem:[#allocation2 + $0x70] sm:$0xff] %v463_v2 }
 0x113   :  { %v411_v4 = vpop.f32.mrf.mxu0 }
 0x114   :  { %v412_v8 = vadd.f32 %v411_v4, %v1239_v63  ;;  %v466_v5 = vpop.f32.mrf.mxu1  ;;  %v557_v9 = vpop.f32.mrf.mxu2 }
 0x115   :  { %v558_v30 = vadd.f32 %v557_v9, %v1244_v1  ;;  %v620_v42 = vpop.f32.mrf.mxu3 }
 0x116   :  { %v467_v10 = vadd.f32 %v466_v5, %v412_v8 }
 0x117   :  { %v1286_v54 = vadd.f32 %v620_v42, %v558_v30 }
 0x118   :  { %892 = vst [vmem:[#allocation2 + $0x80] sm:$0xff] %v467_v10 }
 0x11b   :  { %v646_v7 = vpop.f32.mrf.mxu0 }
 0x11c   :  { %v647_v11 = vadd.f32 %v646_v7, %v1250_v6  ;;  %v711_v13 = vpop.f32.mrf.mxu1  ;;  %v786_v12 = vpop.f32.mrf.mxu2 }
 0x11d   :  { %v841_v21 = vpop.f32.mrf.mxu3 }
 0x11e   :  { %v712_v15 = vadd.f32 %v711_v13, %v647_v11 }
 0x120   :  { %v787_v20 = vadd.f32 %v786_v12, %v712_v15 }
 0x122   :  { %v842_v14 = vadd.f32 %v841_v21, %v787_v20 }
 0x123   :  { %v651_v17 = vpop.f32.mrf.mxu0 }
 0x124   :  { %877 = vst [vmem:[#allocation2 + $0x8] sm:$0xff] %v842_v14  ;;  %v652_v63 = vadd.f32 %v651_v17, %v1258_v18  ;;  %v717_v53 = vpop.f32.mrf.mxu1  ;;  %v790_v22 = vpop.f32.mrf.mxu2 }
 0x125   :  { %v845_v23 = vpop.f32.mrf.mxu3 }
 0x126   :  { %v718_v1 = vadd.f32 %v717_v53, %v652_v63 }
 0x128   :  { %v791_v26 = vadd.f32 %v790_v22, %v718_v1 }
 0x12a   :  { %v846_v19 = vadd.f32 %v845_v23, %v791_v26 }
 0x12b   :  { %v656_v27 = vpop.f32.mrf.mxu0 }
 0x12c   :  { %879 = vst [vmem:[#allocation2 + $0x18] sm:$0xff] %v846_v19  ;;  %v657_v6 = vadd.f32 %v656_v27, %v1262_v24  ;;  %v723_v25 = vpop.f32.mrf.mxu1  ;;  %v794_v28 = vpop.f32.mrf.mxu2 }
 0x12d   :  { %v849_v33 = vpop.f32.mrf.mxu3 }
 0x12e   :  { %v724_v32 = vadd.f32 %v723_v25, %v657_v6 }
 0x130   :  { %v795_v34 = vadd.f32 %v794_v28, %v724_v32 }
 0x132   :  { %v850_v36 = vadd.f32 %v849_v33, %v795_v34 }
 0x133   :  { %v661_v35 = vpop.f32.mrf.mxu0 }
 0x134   :  { %881 = vst [vmem:[#allocation2 + $0x28] sm:$0xff] %v850_v36  ;;  %v662_v18 = vadd.f32 %v661_v35, %v1266_v3  ;;  %v729_v40 = vpop.f32.mrf.mxu1  ;;  %v798_v41 = vpop.f32.mrf.mxu2 }
 0x135   :  { %v853_v39 = vpop.f32.mrf.mxu3 }
 0x136   :  { %v730_v38 = vadd.f32 %v729_v40, %v662_v18 }
 0x138   :  { %v799_v43 = vadd.f32 %v798_v41, %v730_v38 }
 0x13a   :  { %v854_v44 = vadd.f32 %v853_v39, %v799_v43 }
 0x13b   :  { %v666_v46 = vpop.f32.mrf.mxu0 }
 0x13c   :  { %883 = vst [vmem:[#allocation2 + $0x38] sm:$0xff] %v854_v44  ;;  %v667_v24 = vadd.f32 %v666_v46, %v1270_v16  ;;  %v735_v51 = vpop.f32.mrf.mxu1  ;;  %v802_v52 = vpop.f32.mrf.mxu2 }
 0x13d   :  { %v857_v48 = vpop.f32.mrf.mxu3 }
 0x13e   :  { %v736_v47 = vadd.f32 %v735_v51, %v667_v24 }
 0x140   :  { %v803_v49 = vadd.f32 %v802_v52, %v736_v47 }
 0x142   :  { %v858_v50 = vadd.f32 %v857_v48, %v803_v49 }
 0x143   :  { %v671_v55 = vpop.f32.mrf.mxu0 }
 0x144   :  { %885 = vst [vmem:[#allocation2 + $0x48] sm:$0xff] %v858_v50  ;;  %v672_v3 = vadd.f32 %v671_v55, %v1274_v29  ;;  %v741_v58 = vpop.f32.mrf.mxu1  ;;  %v806_v59 = vpop.f32.mrf.mxu2 }
 0x145   :  { %v861_v57 = vpop.f32.mrf.mxu3 }
 0x146   :  { %v742_v56 = vadd.f32 %v741_v58, %v672_v3 }
 0x148   :  { %v807_v60 = vadd.f32 %v806_v59, %v742_v56 }
 0x14a   :  { %v862_v61 = vadd.f32 %v861_v57, %v807_v60 }
 0x14b   :  { %v676_v62 = vpop.f32.mrf.mxu0 }
 0x14c   :  { %887 = vst [vmem:[#allocation2 + $0x58] sm:$0xff] %v862_v61  ;;  %v677_v16 = vadd.f32 %v676_v62, %v1278_v37  ;;  %v747_v2 = vpop.f32.mrf.mxu1  ;;  %v810_v31 = vpop.f32.mrf.mxu2 }
 0x14d   :  { %v865_v4 = vpop.f32.mrf.mxu3 }
 0x14e   :  { %v748_v0 = vadd.f32 %v747_v2, %v677_v16 }
 0x150   :  { %v811_v8 = vadd.f32 %v810_v31, %v748_v0 }
 0x152   :  { %v866_v5 = vadd.f32 %v865_v4, %v811_v8 }
 0x153   :  { %v681_v9 = vpop.f32.mrf.mxu0 }
 0x154   :  { %889 = vst [vmem:[#allocation2 + $0x68] sm:$0xff] %v866_v5  ;;  %v682_v29 = vadd.f32 %v681_v9, %v1282_v45  ;;  %v753_v10 = vpop.f32.mrf.mxu1  ;;  %v814_v30 = vpop.f32.mrf.mxu2 }
 0x155   :  { %v869_v7 = vpop.f32.mrf.mxu3 }
 0x156   :  { %v754_v42 = vadd.f32 %v753_v10, %v682_v29 }
 0x158   :  { %v815_v11 = vadd.f32 %v814_v30, %v754_v42 }
 0x15a   :  { %v870_v13 = vadd.f32 %v869_v7, %v815_v11 }
 0x15b   :  { %v686_v12 = vpop.f32.mrf.mxu0 }
 0x15c   :  { %891 = vst [vmem:[#allocation2 + $0x78] sm:$0xff] %v870_v13  ;;  %v687_v37 = vadd.f32 %v686_v12, %v1286_v54  ;;  %v759_v15 = vpop.f32.mrf.mxu1  ;;  %v818_v21 = vpop.f32.mrf.mxu2 }
 0x15d   :  { %v873_v45 = vpop.f32.mrf.mxu3 }
 0x15e   :  { %v760_v20 = vadd.f32 %v759_v15, %v687_v37 }
 0x160   :  { %v819_v14 = vadd.f32 %v818_v21, %v760_v20 }
 0x162   :  { %v874_v17 = vadd.f32 %v873_v45, %v819_v14 }
 0x164   :  { %893 = vst [vmem:[#allocation2 + $0x88] sm:$0xff] %v874_v17 }
 0x165   :  { %906 = dma.vmem_to_hbm [thread:$0]  %s899_s11, 2304, %s901_s14, [#allocation3], %s942_s15, %s942_s15, %s943_s16  }
 0x166   :  { %939 = dma.done.wait [#allocation3], 2304  }
 0x167   :  { %940 = vsyncadd [#allocation3], 4294964992 }
 0x168   :  { %911 = vsyncpa [#allocation3], 1 }

</bundles_post_ra>
